<compile_context>
chip_gen: v7x
topology: tpu7x:2x2x1
jax: 0.10.0
libtpu: 0.0.40
codegen_flags: <defaults>
</compile_context>

<pallas_src>
import jax
import jax.numpy as jnp
from jax.experimental import pallas as pl
from jax.experimental.pallas import tpu as pltpu

HIDDEN = 30          # logical hidden size (matches the PyTorch module)
ACTIONS_PAD_TO = 8   # pad the tiny action dim to a sublane multiple
LANE = 128           # TPU lane width


def _round_up(x, m):
    return ((x + m - 1) // m) * m


def mlp_kernel(xt_ref, w1t_ref, b1_ref, w2t_ref, b2_ref, out_ref):
    # Fused 2-layer MLP on one batch tile; batch lives on the lane dimension.
    xt = xt_ref[...]                                        # (in_size, TB) f32
    h = jnp.dot(w1t_ref[...], xt,
                preferred_element_type=jnp.float32)         # (HIDDEN_PAD, TB)
    h = jnp.maximum(h + b1_ref[...], 0.0)                   # bias + ReLU in f32
    q = jnp.dot(w2t_ref[...], h,
                preferred_element_type=jnp.float32)         # (N_pad, TB)
    out_ref[...] = (q + b2_ref[...]).astype(out_ref.dtype)


def network_forward(state, padded_params, nb_actions, *,
                    n_tiles_target=2, tb_cap=4096, min_pallas_batch=128):
    """state: (B, input_size) f32.
    padded_params: (w1t, b1, w2t, b2) already transposed + zero-padded:
        w1t: (HIDDEN_PAD, input_size), b1: (HIDDEN_PAD, 1),
        w2t: (N_pad, HIDDEN_PAD),      b2: (N_pad, 1).
    Returns (B, nb_actions) Q-values.
    """
    w1t, b1, w2t, b2 = padded_params
    B, in_size = state.shape
    hp = w1t.shape[0]
    np_ = w2t.shape[0]

    # Act-time fast path: for tiny batches XLA's fused GEMM beats the
    # custom-call + grid + pad/slice overhead.  Zero-padded params are safe:
    # padded hidden units are relu(0)=0 and padded w2 rows are 0.
    if B < min_pallas_batch:
        h = jnp.maximum(state @ w1t.T + b1.T, 0.0)
        return (h @ w2t.T + b2.T)[:, :nb_actions]

    # Batch tile: multiple of 128 (lane width), derived from B so large batches
    # split into ~n_tiles_target balanced tiles (both v7x TCs busy), capped to
    # keep per-tile VMEM tiny.
    tb = min(_round_up(max(pl.cdiv(B, n_tiles_target), 1), LANE), tb_cap)
    b_pad = _round_up(B, tb)
    num_tiles = b_pad // tb

    # Batch on the lane (last) dimension.
    xt = state.T                                            # (in_size, B)
    if b_pad != B:
        xt = jnp.pad(xt, ((0, 0), (0, b_pad - B)))

    out = pl.pallas_call(
        mlp_kernel,
        out_shape=jax.ShapeDtypeStruct((np_, b_pad), jnp.float32),
        grid=(num_tiles,),
        in_specs=[
            # state tile: one lane-dense batch slab per grid step.
            pl.BlockSpec((in_size, tb), lambda i: (0, i)),
            # weights / biases: constant index_map -> VMEM-resident.
            pl.BlockSpec((hp, in_size), lambda i: (0, 0)),
            pl.BlockSpec((hp, 1), lambda i: (0, 0)),
            pl.BlockSpec((np_, hp), lambda i: (0, 0)),
            pl.BlockSpec((np_, 1), lambda i: (0, 0)),
        ],
        out_specs=pl.BlockSpec((np_, tb), lambda i: (0, i)),
        compiler_params=pltpu.CompilerParams(
            dimension_semantics=("parallel",),   # split batch tiles across v7x TCs
        ),
    )(xt, w1t, b1, w2t, b2)

    # Strip padded action rows / batch columns; back to (B, nb_actions).
    return out[:nb_actions, :B].T


def init_params(key, input_size, nb_actions, hidden=HIDDEN):
    # Deterministic init mimicking PyTorch nn.Linear default:
    # U(-1/sqrt(fan_in), 1/sqrt(fan_in)) for both weight and bias.
    k1, k2, k3, k4 = jax.random.split(key, 4)
    bound1 = 1.0 / jnp.sqrt(jnp.float32(input_size))
    bound2 = 1.0 / jnp.sqrt(jnp.float32(hidden))
    w1 = jax.random.uniform(k1, (input_size, hidden), jnp.float32, -bound1, bound1)
    b1 = jax.random.uniform(k2, (1, hidden), jnp.float32, -bound1, bound1)
    w2 = jax.random.uniform(k3, (hidden, nb_actions), jnp.float32, -bound2, bound2)
    b2 = jax.random.uniform(k4, (1, nb_actions), jnp.float32, -bound2, bound2)
    return w1, b1, w2, b2


def pad_params(params):
    """Transpose to the batch-on-lanes layout and zero-pad hidden 30->32 and
    nb_actions->8 once, offline.  Zero padding keeps the math identical."""
    w1, b1, w2, b2 = params
    hidden = w1.shape[1]
    nb_actions = w2.shape[1]
    hp = _round_up(hidden, 8)
    np_ = _round_up(nb_actions, ACTIONS_PAD_TO)
    w1t = jnp.pad(w1.T, ((0, hp - hidden), (0, 0)))                       # (hp, in)
    b1t = jnp.pad(b1.T, ((0, hp - hidden), (0, 0)))                       # (hp, 1)
    w2t = jnp.pad(w2.T, ((0, np_ - nb_actions), (0, hp - hidden)))        # (np, hp)
    b2t = jnp.pad(b2.T, ((0, np_ - nb_actions), (0, 0)))                  # (np, 1)
    return w1t, b1t, w2t, b2t


if __name__ == "__main__":
    key = jax.random.PRNGKey(0)
    input_size = 5     # e.g. car-sensor state size (classic self-driving-car DQN)
    nb_actions = 3
    batch = 8          # small demo batch

    k_state, k_params = jax.random.split(key)
    state = jax.random.normal(k_state, (batch, input_size), jnp.float32)
    params = init_params(k_params, input_size, nb_actions)
    padded = pad_params(params)

    # Reference in plain JAX (same math as the PyTorch forward), unpadded params.
    w1, b1, w2, b2 = params
    ref = jnp.maximum(state @ w1 + b1, 0.0) @ w2 + b2

    # 1) Force the Pallas kernel even at the tiny demo batch (functional check).
    fwd_pallas = jax.jit(
        lambda s: network_forward(s, padded, nb_actions, min_pallas_batch=0))
    q_values = jax.block_until_ready(fwd_pallas(state))
    assert q_values.shape == (batch, nb_actions)
    assert jnp.allclose(q_values, ref, atol=1e-5, rtol=1e-5)

    # 2) Default act-time fast path (non-Pallas) at small batch.
    fwd_auto = jax.jit(lambda s: network_forward(s, padded, nb_actions))
    q_fast = jax.block_until_ready(fwd_auto(state))
    assert jnp.allclose(q_fast, ref, atol=1e-5, rtol=1e-5)

    # 3) Replay-sized batch: exercises the tiled Pallas path (2 balanced tiles).
    big_state = jax.random.normal(jax.random.PRNGKey(1), (1030, input_size),
                                  jnp.float32)
    q_big = jax.block_until_ready(fwd_auto(big_state))
    ref_big = jnp.maximum(big_state @ w1 + b1, 0.0) @ w2 + b2
    assert q_big.shape == (1030, nb_actions)
    assert jnp.allclose(q_big, ref_big, atol=1e-4, rtol=1e-4)

    print("KERNEL_OK")
</pallas_src>

<mosaic_0001>
module attributes {stable_mosaic.version = 11 : i64} {
  func.func @mlp_kernel(%arg0: i32, %arg1: memref<5x128xf32, #tpu.memory_space<vmem>>, %arg2: memref<32x5xf32, #tpu.memory_space<vmem>>, %arg3: memref<32x1xf32, #tpu.memory_space<vmem>>, %arg4: memref<8x32xf32, #tpu.memory_space<vmem>>, %arg5: memref<8x1xf32, #tpu.memory_space<vmem>>, %arg6: memref<8x128xf32, #tpu.memory_space<vmem>>) attributes {dimension_semantics = [#tpu.dimension_semantics<parallel>], iteration_bounds = array<i64: 1>, scalar_prefetch = 0 : i64, scratch_operands = 0 : i64, tpu.core_type = #tpu.core_type<tc>, window_params = [{transform_indices = @transform_0, window_bounds = array<i64: 5, 128>}, {pipeline_mode = #tpu.pipeline_mode<synchronous>, transform_indices = @transform_1, window_bounds = array<i64: 32, 5>}, {pipeline_mode = #tpu.pipeline_mode<synchronous>, transform_indices = @transform_2, window_bounds = array<i64: 32, 1>}, {pipeline_mode = #tpu.pipeline_mode<synchronous>, transform_indices = @transform_3, window_bounds = array<i64: 8, 32>}, {pipeline_mode = #tpu.pipeline_mode<synchronous>, transform_indices = @transform_4, window_bounds = array<i64: 8, 1>}, {transform_indices = @transform_5, window_bounds = array<i64: 8, 128>}]} {
    %c0 = arith.constant 0 : index
    %c0_0 = arith.constant 0 : index
    %0 = vector.load %arg1[%c0, %c0_0] : memref<5x128xf32, #tpu.memory_space<vmem>>, vector<5x128xf32>
    %c0_1 = arith.constant 0 : index
    %c0_2 = arith.constant 0 : index
    %1 = vector.load %arg2[%c0_1, %c0_2] : memref<32x5xf32, #tpu.memory_space<vmem>>, vector<32x5xf32>
    %cst = arith.constant dense<0.000000e+00> : vector<32x128xf32>
    %2 = tpu.matmul %1, %0, %cst {dimension_numbers = #tpu.dot_dimension_numbers<[1], [0], [0], [1], [0, 0, 1, 1], [], []>} : vector<32x5xf32>, vector<5x128xf32>, vector<32x128xf32> -> vector<32x128xf32>
    %c0_3 = arith.constant 0 : index
    %c0_4 = arith.constant 0 : index
    %3 = vector.load %arg3[%c0_3, %c0_4] : memref<32x1xf32, #tpu.memory_space<vmem>>, vector<32x1xf32>
    %4 = vector.broadcast %3 : vector<32x1xf32> to vector<32x128xf32>
    %5 = arith.addf %2, %4 : vector<32x128xf32>
    %cst_5 = arith.constant 0.000000e+00 : f32
    %6 = vector.broadcast %cst_5 : f32 to vector<32x128xf32>
    %7 = arith.maximumf %5, %6 : vector<32x128xf32>
    %c0_6 = arith.constant 0 : index
    %c0_7 = arith.constant 0 : index
    %8 = vector.load %arg4[%c0_6, %c0_7] : memref<8x32xf32, #tpu.memory_space<vmem>>, vector<8x32xf32>
    %cst_8 = arith.constant dense<0.000000e+00> : vector<8x128xf32>
    %9 = tpu.matmul %8, %7, %cst_8 {dimension_numbers = #tpu.dot_dimension_numbers<[1], [0], [0], [1], [0, 0, 1, 1], [], []>} : vector<8x32xf32>, vector<32x128xf32>, vector<8x128xf32> -> vector<8x128xf32>
    %c0_9 = arith.constant 0 : index
    %c0_10 = arith.constant 0 : index
    %10 = vector.load %arg5[%c0_9, %c0_10] : memref<8x1xf32, #tpu.memory_space<vmem>>, vector<8x1xf32>
    %11 = vector.broadcast %10 : vector<8x1xf32> to vector<8x128xf32>
    %12 = arith.addf %9, %11 : vector<8x128xf32>
    %c0_11 = arith.constant 0 : index
    %c0_12 = arith.constant 0 : index
    %13 = vector.load %arg6[%c0_11, %c0_12] : memref<8x128xf32, #tpu.memory_space<vmem>>, vector<8x128xf32>
    tpu.vector_store %arg6[%c0_11, %c0_12], %12 {strides = array<i32>} : memref<8x128xf32, #tpu.memory_space<vmem>>, vector<8x128xf32>,
    return
  }
  func.func @transform_0(%arg0: i32) -> (i32, i32) {
    %c0_i32 = arith.constant 0 : i32
    %c0_i32_0 = arith.constant 0 : i32
    return %c0_i32, %arg0 : i32, i32
  }
  func.func @transform_1(%arg0: i32) -> (i32, i32) {
    %c0_i32 = arith.constant 0 : i32
    %c0_i32_0 = arith.constant 0 : i32
    %c0_i32_1 = arith.constant 0 : i32
    return %c0_i32, %c0_i32_0 : i32, i32
  }
  func.func @transform_2(%arg0: i32) -> (i32, i32) {
    %c0_i32 = arith.constant 0 : i32
    %c0_i32_0 = arith.constant 0 : i32
    %c0_i32_1 = arith.constant 0 : i32
    return %c0_i32, %c0_i32_0 : i32, i32
  }
  func.func @transform_3(%arg0: i32) -> (i32, i32) {
    %c0_i32 = arith.constant 0 : i32
    %c0_i32_0 = arith.constant 0 : i32
    %c0_i32_1 = arith.constant 0 : i32
    return %c0_i32, %c0_i32_0 : i32, i32
  }
  func.func @transform_4(%arg0: i32) -> (i32, i32) {
    %c0_i32 = arith.constant 0 : i32
    %c0_i32_0 = arith.constant 0 : i32
    %c0_i32_1 = arith.constant 0 : i32
    return %c0_i32, %c0_i32_0 : i32, i32
  }
  func.func @transform_5(%arg0: i32) -> (i32, i32) {
    %c0_i32 = arith.constant 0 : i32
    %c0_i32_0 = arith.constant 0 : i32
    return %c0_i32, %arg0 : i32, i32
  }
}

</mosaic_0001>

<bundles_post_ra>
// kernel: _lambda_.1
= control target key start
LH: loop header
LB: loop body
LE: loop exit
PB: predicated region body
PF: predicated region fallthrough
CT: control target
= control target key end

     0   :  { %10 = vsyncpa [#allocation3], 0  ;;  %s330_s18 = smov [#allocation2]   ;;  %s407_s0 = inlined_call_operand.vmem [shape: f32[5,128], index: 0, kind: input, shape index: {}]   ;;  %s408_s1 = inlined_call_operand.hbm [shape: f32[32,5], index: 1, kind: input, shape index: {}]   ;;  %s409_s2 = inlined_call_operand.vmem [shape: f32[32,1], index: 2, kind: input, shape index: {}]   ;;  %s410_s3 = inlined_call_operand.vmem [shape: f32[8,32], index: 3, kind: input, shape index: {}]   ;;  %s411_s4 = inlined_call_operand.vmem [shape: f32[8,1], index: 4, kind: input, shape index: {}]   ;;  %s412_s5 = inlined_call_operand.vmem [shape: f32[8,128], index: 5, kind: output, shape index: {}]  }
   0x1   :  { %s18_s19 = sshll.u32 %s330_s18, 4  ;;  %s306_s22 = scalar_lea.hbm %s408_s1, 512  ;;  %s19_s19 = int_to_ptr.vmem [resolvable:$true] %s18_s19 }
   0x2   :  { %p307_p0 = scmp.ne.s32.totalorder %s408_s1, %s306_s22  ;;  %p310_p1 = scmp.lt.u32.totalorder %s306_s22, %s408_s1 }
   0x4   :  { %p312_p2 = pnand %p310_p1, %p307_p0 }
   0x6   :  { %315 = shalt.err (!%p312_p2)
}
   0x7   :  { %s316_s27 = scalar_lea.vmem %s19_s19, 512  ;;  %p321_p4 = scmp.lt.s32.totalorder %s19_s19, %s19_s19 }
   0x8   :  { %p317_p3 = scmp.ne.s32.totalorder %s19_s19, %s316_s27  ;;  %p322_p5 = scmp.lt.s32.totalorder %s316_s27, %s316_s27 }
   0xa   :  { %p323_p6 = por %p322_p5, %p321_p4 }
   0xc   :  { %p324_p7 = pnand %p323_p6, %p317_p3 }
   0xe   :  { %327 = shalt.err (!%p324_p7)
}
   0xf   :  { %s331_s28 = smov 128   ;;  %s332_s29 = smov 8  }
  0x10   :  { %24 = dma.hbm_to_vmem [thread:$0]  %s408_s1, 512, %s19_s19, [#allocation3], %s331_s28, %s331_s28, %s332_s29  }
  0x11   :  { %328 = dma.done.wait [#allocation3], 512  }
  0x12   :  { %329 = vsyncadd [#allocation3], 4294966784  ;;  %v333_v0 = vmov 0   ;;  %vm76_vm0 = vcmask 1044480   ;;  %vm63_vm1 = vcmask 39936   ;;  %v35_v2 = vld [vmem:[#allocation2] sm:$0xff] }
  0x13   :  { %304 = vset.pattern.permute.xlu0 %v333_v0  ;;  %305 = vset.pattern.permute.xlu1 %v333_v0  ;;  %v34_v1 = vld [vmem:[%s407_s0] sm:$0x1f]  ;;  %v36_v3 = vld [vmem:[#allocation2 + $0x8] sm:$0xff]  ;;  %v37_v4 = vld [vmem:[#allocation2 + $0x10] sm:$0xff]  ;;  %v334_v11 = vmov 0.0|0.0   ;;  %vm335_vm2 = vmmov 0  }
  0x14   :  { %272 = vmatprep.subr.msk.mxu0 %vm76_vm0, %v34_v1  ;;  %274 = vmatprep.mubr.msk.f32.mxu0 %vm63_vm1, %v35_v2  ;;  %v39_v5 = vld [vmem:[%s409_s2] sm:$0xff]  ;;  %v41_v6 = vld [vmem:[%s409_s2 + $0x10] sm:$0xff]  ;;  %v40_v7 = vld [vmem:[%s409_s2 + $0x8] sm:$0xff]  ;;  %v336_v12 = vmov 0.0   ;;  %vm176_vm3 = vcmask 261120  }
  0x15   :  { %273 = vmatpush3.msk.msra.mxu0 %vm76_vm0, %v34_v1  ;;  %45 = vperm.xlu0 %304, %v39_v5   ;;  %v38_v8 = vld [vmem:[#allocation2 + $0x18] sm:$0xff]  ;;  %v42_v9 = vld [vmem:[%s409_s2 + $0x18] sm:$0xff] }
  0x16   :  { %275 = vmatmul.mubr.msk.f32.vlgmr.msra.gmra.mrb[0].mxu0 %vm63_vm1, %v36_v3  ;;  %55 = vperm.xlu1 %305, %v41_v6   ;;  %v170_v10 = vld [vmem:[%s411_s4] sm:$0xff] }
  0x17   :  { %277 = vmatprep.mubr.msk.f32.mxu0 %vm63_vm1, %v37_v4  ;;  %291 = vmatprep.subr.bf16.mxu1 %v334_v11  ;;  %v169_v31 = vld [vmem:[%s410_s3] sm:$0xff] }
  0x18   :  { %288 = vmatprep.mubr.msk.f32.mxu1 %vm335_vm2, %v336_v12 }
  0x19   :  { %50 = vperm.xlu0 %304, %v40_v7  }
  0x1a   :  { %278 = vmatmul.mubr.msk.f32.gmra.mrb[2].mxu0 %vm63_vm1, %v38_v8  ;;  %60 = vperm.xlu1 %305, %v42_v9  }
  0x1d   :  { %173 = vperm.xlu0 %304, %v170_v10  }
  0x94   :  { %v46_v13 = vpop.permute.xlu0 %45 }
  0x95   :  { %v56_v14 = vpop.permute.xlu1 %55 }
  0x98   :  { %v51_v15 = vpop.permute.xlu0 %50 }
  0x99   :  { %v61_v21 = vpop.permute.xlu1 %60 }
  0x9c   :  { %v174_v32 = vpop.permute.xlu0 %173 }
  0xe9   :  { %v276_v16 = vpop.f32.mrb[0].mxu0 }
  0xea   :  { %v152_v17 = vadd.f32 %v276_v16, %v51_v15  ;;  %v146_v18 = vpop.f32.mrb[1].mxu0 }
  0xeb   :  { %v147_v19 = vadd.f32 %v146_v18, %v46_v13 }
  0xec   :  { %v166_v20 = vmax.f32 %v152_v17, 0.0 }
  0xed   :  { %v165_v22 = vmax.f32 %v147_v19, 0.0  ;;  %v279_v23 = vpop.f32.mrb[2].mxu0 }
  0xee   :  { %v162_v24 = vadd.f32 %v279_v23, %v61_v21  ;;  %v156_v25 = vpop.f32.mrb[3].mxu0 }
  0xef   :  { %v157_v26 = vadd.f32 %v156_v25, %v56_v14  ;;  %v292_v27 = vpack.c.bf16 %v166_v20, %v165_v22 }
  0xf0   :  { %v168_v28 = vmax.f32 %v162_v24, 0.0 }
  0xf1   :  { %v167_v29 = vmax.f32 %v157_v26, 0.0  ;;  %293 = vmatpush3.bf16.msra.mxu1 %v292_v27 }
  0xf2   :  { %294 = vmatprep.subr.bf16.mxu1 %v334_v11 }
  0xf3   :  { %v295_v30 = vpack.c.bf16 %v168_v28, %v167_v29 }
  0xf5   :  { %296 = vmatpush3.bf16.msra.mxu1 %v295_v30 }
  0xf8   :  { %289 = vmatmul.mubr.msk.f32.vlgmr.msra.gmra.mrb[0].mxu1 %vm176_vm3, %v169_v31 }
 0x1cb   :  { %v246_v33 = vpop.f32.mrb[0].mxu1 }
 0x1cc   :  { %v247_v34 = vadd.f32 %v246_v33, %v174_v32  ;;  %v290_v35 = vpop.f32.mrb[1].mxu1 }
 0x1ce   :  { %250 = vst [vmem:[%s412_s5] sm:$0xff] %v247_v34 }
 0x1cf   :  { %255 = vsyncpa [#allocation3], 1 }

</bundles_post_ra>
